<compile_context>
chip_gen: v7x
topology: tpu7x:2x2x1
jax: 0.10.0
libtpu: 0.0.40
codegen_flags: <defaults>
</compile_context>

<pallas_src>
import jax
import jax.numpy as jnp
from jax.experimental import pallas as pl
from jax.experimental.pallas import tpu as pltpu


# ---------------------------------------------------------------------------
# Stage 1: z = LayerNorm(x @ W1 + b1)      (tiny: z is only M x F)
# ---------------------------------------------------------------------------
def ln_in_proj_kernel(x_ref, w1_ref, b1_ref, g_ref, beta_ref, z_ref):
    w1 = w1_ref[...]
    y = jnp.dot(x_ref[...].astype(w1.dtype), w1,
                preferred_element_type=jnp.float32)
    y = y + b1_ref[...]                              # b1 stays f32
    mean = jnp.mean(y, axis=-1, keepdims=True)
    centered = y - mean
    var = jnp.mean(centered * centered, axis=-1, keepdims=True)
    inv = jax.lax.rsqrt(var + 1e-5)
    z = centered * inv * g_ref[...] + beta_ref[...]  # gamma/beta stay f32
    # Store once in the matmul dtype (bf16 by default) so stage 2 never
    # re-packs z per OUT tile.
    z_ref[...] = z.astype(z_ref.dtype)


# ---------------------------------------------------------------------------
# Stage 2: out = z @ W3 + b3   — pure HBM weight-streaming matmul
# ---------------------------------------------------------------------------
def out_proj_kernel(z_ref, w3_ref, b3_ref, o_ref):
    acc = jnp.dot(z_ref[...], w3_ref[...], preferred_element_type=jnp.float32)
    o_ref[...] = (acc + b3_ref[...]).astype(o_ref.dtype)


# ---------------------------------------------------------------------------
# Wrappers
# ---------------------------------------------------------------------------
def _default_vmem_limit_bytes():
    """~75% of per-core VMEM (v5e/v6e: ~96 MiB, v7x: ~48 MiB); safe fallback."""
    try:
        cap = int(pltpu.get_tpu_info().vmem_capacity_bytes)
        return (cap * 3) // 4
    except Exception:
        return 48 * 1024 * 1024


def prepare_params(params, *, tn=512, weight_dtype=jnp.bfloat16):
    """ONE-TIME parameter preparation (call outside the per-forward path).

    * W1/W3 cast to `weight_dtype` (bf16 default halves the dominant W3 HBM
      stream; pass None to keep exact f32 semantics).
    * b1/b3/gamma/beta always stay f32 (a few KiB — nothing to save).
    * W3/b3 are padded ONCE to a multiple of tn so the forward never pads.
    """
    w1_t, b1, gamma, beta, w3_t, b3 = params
    b1 = b1.astype(jnp.float32)
    gamma = gamma.astype(jnp.float32)
    beta = beta.astype(jnp.float32)
    b3 = b3.astype(jnp.float32)
    if weight_dtype is not None:
        w1_t = w1_t.astype(weight_dtype)
        w3_t = w3_t.astype(weight_dtype)
    n_out = w3_t.shape[1]
    n_pad = pl.cdiv(n_out, tn) * tn
    if n_pad != n_out:
        w3_t = jnp.pad(w3_t, ((0, 0), (0, n_pad - n_out)))
        b3 = jnp.pad(b3, ((0, 0), (0, n_pad - n_out)))
    return {"w1_t": w1_t, "b1": b1, "gamma": gamma, "beta": beta,
            "w3_t": w3_t, "b3": b3, "n_out": n_out, "tn": tn}


def my_model_forward(x, prep, *, tm=None, vmem_limit_bytes=None):
    w1_t, b1 = prep["w1_t"], prep["b1"]
    gamma, beta = prep["gamma"], prep["beta"]
    w3_t, b3 = prep["w3_t"], prep["b3"]
    n_out, tn = prep["n_out"], prep["tn"]

    M, F = x.shape
    n_pad = w3_t.shape[1]
    assert n_pad % tn == 0

    if tm is None:
        # Batch is tiny in the real workload; cap at MXU height for larger M.
        tm = M if M <= 256 else 256
    assert M % tm == 0

    if vmem_limit_bytes is None:
        vmem_limit_bytes = _default_vmem_limit_bytes()

    z_dtype = w1_t.dtype  # bf16 by default -> stage 2 matmul never re-casts z
    z_bytes = M * F * jnp.dtype(z_dtype).itemsize

    # ---- Stage 1: z = LN(x @ W1 + b1) (small, computed once per call) ----
    z = pl.pallas_call(
        ln_in_proj_kernel,
        out_shape=jax.ShapeDtypeStruct((M, F), z_dtype),
        grid_spec=pltpu.PrefetchScalarGridSpec(
            num_scalar_prefetch=0,
            grid=(M // tm,),
            in_specs=[
                pl.BlockSpec((tm, F), lambda i: (i, 0)),   # x
                pl.BlockSpec((F, F), lambda i: (0, 0)),    # W1 (full-K, resident)
                pl.BlockSpec((1, F), lambda i: (0, 0)),    # b1   (f32)
                pl.BlockSpec((1, F), lambda i: (0, 0)),    # gamma(f32)
                pl.BlockSpec((1, F), lambda i: (0, 0)),    # beta (f32)
            ],
            out_specs=pl.BlockSpec((tm, F), lambda i: (i, 0)),
        ),
        compiler_params=pltpu.CompilerParams(
            dimension_semantics=("parallel",),
            vmem_limit_bytes=vmem_limit_bytes,
        ),
        cost_estimate=pl.CostEstimate(
            flops=2 * M * F * F + 10 * M * F,
            transcendentals=M,
            bytes_accessed=(x.size * x.dtype.itemsize
                            + w1_t.size * w1_t.dtype.itemsize
                            + z_bytes),
        ),
    )(x, w1_t, b1, gamma, beta)

    # ---- Stage 2: out = z @ W3 + b3 (dominant W3 HBM stream) ----
    out = pl.pallas_call(
        out_proj_kernel,
        out_shape=jax.ShapeDtypeStruct((M, n_pad), x.dtype),
        grid_spec=pltpu.PrefetchScalarGridSpec(
            num_scalar_prefetch=0,
            grid=(M // tm, n_pad // tn),
            in_specs=[
                pl.BlockSpec((tm, F), lambda i, j: (i, 0)),   # z (resident per i)
                pl.BlockSpec((F, tn), lambda i, j: (0, j)),   # W3 tile (streamed)
                pl.BlockSpec((1, tn), lambda i, j: (0, j)),   # b3 tile (f32)
            ],
            out_specs=pl.BlockSpec((tm, tn), lambda i, j: (i, j)),
        ),
        compiler_params=pltpu.CompilerParams(
            # No scratch carried across steps -> both axes parallel, so the OUT
            # stream can split across both TensorCores on v7x.
            dimension_semantics=("parallel", "parallel"),
            vmem_limit_bytes=vmem_limit_bytes,
        ),
        cost_estimate=pl.CostEstimate(
            flops=2 * M * F * n_pad,
            transcendentals=0,
            bytes_accessed=(w3_t.size * w3_t.dtype.itemsize
                            + z_bytes
                            + M * n_pad * x.dtype.itemsize),
        ),
    )(z, w3_t, b3)

    if n_pad != n_out:
        out = out[:, :n_out]
    return out


# ------------------------------------ Reference -----------------------------------------
def reference_forward(x, params):
    w1_t, b1, gamma, beta, w3_t, b3 = params
    y = x @ w1_t + b1
    mean = jnp.mean(y, axis=-1, keepdims=True)
    var = jnp.mean((y - mean) ** 2, axis=-1, keepdims=True)
    z = (y - mean) * jax.lax.rsqrt(var + 1e-5) * gamma + beta
    return z @ w3_t + b3


if __name__ == "__main__":
    # Scaled-down but structurally identical config.
    # Real model: F = 2048, OUT = 30000 (30000 % 128 != 0 — like OUT=300 here).
    B, F, OUT = 8, 256, 300

    key = jax.random.PRNGKey(0)
    kx, k1, k2, k3, k4, k5, k6 = jax.random.split(key, 7)

    x = jax.random.normal(kx, (B, F), dtype=jnp.float32)

    # weight1/bias1: Linear(F, F) -- PyTorch weight is [out, in]; stored transposed.
    w1_t = jax.random.normal(k1, (F, F), dtype=jnp.float32) * 0.02
    b1 = jax.random.normal(k2, (1, F), dtype=jnp.float32) * 0.02
    # weight2/bias2: LayerNorm(F) gamma/beta
    gamma = 1.0 + 0.1 * jax.random.normal(k3, (1, F), dtype=jnp.float32)
    beta = 0.1 * jax.random.normal(k4, (1, F), dtype=jnp.float32)
    # weight3/bias3: Linear(F, OUT) -- stored transposed as [F, OUT]
    w3_t = jax.random.normal(k5, (F, OUT), dtype=jnp.float32) * 0.02
    b3 = jax.random.normal(k6, (1, OUT), dtype=jnp.float32) * 0.02

    params = (w1_t, b1, gamma, beta, w3_t, b3)
    ref = reference_forward(x, params)

    # f32 weights: exact semantics of the PyTorch module.
    prep_f32 = prepare_params(params, tn=128, weight_dtype=None)
    out = my_model_forward(x, prep_f32)
    jax.block_until_ready(out)
    assert out.shape == (B, OUT)
    assert jnp.allclose(out, ref, atol=1e-3, rtol=1e-3)

    # Default path: bf16 weight-only storage (halves the dominant W3 HBM
    # stream at real scale); biases / LN params stay f32, matmuls accumulate
    # in f32, LayerNorm math stays f32.
    prep_bf16 = prepare_params(params, tn=128)  # weight_dtype=bf16 default
    out_bf16 = my_model_forward(x, prep_bf16)
    jax.block_until_ready(out_bf16)
    assert out_bf16.shape == (B, OUT)
    assert jnp.allclose(out_bf16, ref, atol=1e-1, rtol=1e-1)

    print("KERNEL_OK")
</pallas_src>

<mosaic_0001>
module attributes {stable_mosaic.version = 11 : i64} {
  func.func @ln_in_proj_kernel(%arg0: i32, %arg1: memref<8x256xf32, #tpu.memory_space<vmem>>, %arg2: memref<256x256xf32, #tpu.memory_space<vmem>>, %arg3: memref<1x256xf32, #tpu.memory_space<vmem>>, %arg4: memref<1x256xf32, #tpu.memory_space<vmem>>, %arg5: memref<1x256xf32, #tpu.memory_space<vmem>>, %arg6: memref<8x256xf32, #tpu.memory_space<vmem>>) attributes {dimension_semantics = [#tpu.dimension_semantics<parallel>], iteration_bounds = array<i64: 1>, scalar_prefetch = 0 : i64, scratch_operands = 0 : i64, tpu.core_type = #tpu.core_type<tc>, window_params = [{transform_indices = @transform_0, window_bounds = array<i64: 8, 256>}, {pipeline_mode = #tpu.pipeline_mode<synchronous>, transform_indices = @transform_1, window_bounds = array<i64: 256, 256>}, {pipeline_mode = #tpu.pipeline_mode<synchronous>, transform_indices = @transform_2, window_bounds = array<i64: 1, 256>}, {pipeline_mode = #tpu.pipeline_mode<synchronous>, transform_indices = @transform_3, window_bounds = array<i64: 1, 256>}, {pipeline_mode = #tpu.pipeline_mode<synchronous>, transform_indices = @transform_4, window_bounds = array<i64: 1, 256>}, {transform_indices = @transform_5, window_bounds = array<i64: 8, 256>}]} {
    %c0 = arith.constant 0 : index
    %c0_0 = arith.constant 0 : index
    %0 = vector.load %arg2[%c0, %c0_0] : memref<256x256xf32, #tpu.memory_space<vmem>>, vector<256x256xf32>
    %c0_1 = arith.constant 0 : index
    %c0_2 = arith.constant 0 : index
    %1 = vector.load %arg1[%c0_1, %c0_2] : memref<8x256xf32, #tpu.memory_space<vmem>>, vector<8x256xf32>
    %cst = arith.constant dense<0.000000e+00> : vector<8x256xf32>
    %2 = tpu.matmul %1, %0, %cst {dimension_numbers = #tpu.dot_dimension_numbers<[1], [0], [0], [1], [0, 0, 1, 1], [], []>} : vector<8x256xf32>, vector<256x256xf32>, vector<8x256xf32> -> vector<8x256xf32>
    %c0_3 = arith.constant 0 : index
    %c0_4 = arith.constant 0 : index
    %3 = vector.load %arg3[%c0_3, %c0_4] : memref<1x256xf32, #tpu.memory_space<vmem>>, vector<1x256xf32>
    %4 = vector.broadcast %3 : vector<1x256xf32> to vector<8x256xf32>
    %5 = arith.addf %2, %4 : vector<8x256xf32>
    %cst_5 = arith.constant dense<0.000000e+00> : vector<8xf32>
    %6 = vector.multi_reduction <add>, %5, %cst_5 [1] : vector<8x256xf32> to vector<8xf32>
    %7 = vector.shape_cast %6 : vector<8xf32> to vector<8x1xf32>
    %cst_6 = arith.constant 2.560000e+02 : f32
    %8 = vector.broadcast %cst_6 : f32 to vector<8x1xf32>
    %9 = arith.divf %7, %8 : vector<8x1xf32>
    %10 = vector.broadcast %9 : vector<8x1xf32> to vector<8x256xf32>
    %11 = arith.subf %5, %10 : vector<8x256xf32>
    %12 = arith.mulf %11, %11 : vector<8x256xf32>
    %cst_7 = arith.constant dense<0.000000e+00> : vector<8xf32>
    %13 = vector.multi_reduction <add>, %12, %cst_7 [1] : vector<8x256xf32> to vector<8xf32>
    %14 = vector.shape_cast %13 : vector<8xf32> to vector<8x1xf32>
    %cst_8 = arith.constant 2.560000e+02 : f32
    %15 = vector.broadcast %cst_8 : f32 to vector<8x1xf32>
    %16 = arith.divf %14, %15 : vector<8x1xf32>
    %cst_9 = arith.constant 9.99999974E-6 : f32
    %17 = vector.broadcast %cst_9 : f32 to vector<8x1xf32>
    %18 = arith.addf %16, %17 : vector<8x1xf32>
    %19 = math.rsqrt %18 : vector<8x1xf32>
    %20 = vector.broadcast %19 : vector<8x1xf32> to vector<8x256xf32>
    %21 = arith.mulf %11, %20 : vector<8x256xf32>
    %c0_10 = arith.constant 0 : index
    %c0_11 = arith.constant 0 : index
    %22 = vector.load %arg4[%c0_10, %c0_11] : memref<1x256xf32, #tpu.memory_space<vmem>>, vector<1x256xf32>
    %23 = vector.broadcast %22 : vector<1x256xf32> to vector<8x256xf32>
    %24 = arith.mulf %21, %23 : vector<8x256xf32>
    %c0_12 = arith.constant 0 : index
    %c0_13 = arith.constant 0 : index
    %25 = vector.load %arg5[%c0_12, %c0_13] : memref<1x256xf32, #tpu.memory_space<vmem>>, vector<1x256xf32>
    %26 = vector.broadcast %25 : vector<1x256xf32> to vector<8x256xf32>
    %27 = arith.addf %24, %26 : vector<8x256xf32>
    %c0_14 = arith.constant 0 : index
    %c0_15 = arith.constant 0 : index
    %28 = vector.load %arg6[%c0_14, %c0_15] : memref<8x256xf32, #tpu.memory_space<vmem>>, vector<8x256xf32>
    tpu.vector_store %arg6[%c0_14, %c0_15], %27 {strides = array<i32>} : memref<8x256xf32, #tpu.memory_space<vmem>>, vector<8x256xf32>,
    return
  }
  func.func @transform_0(%arg0: i32) -> (i32, i32) {
    %c0_i32 = arith.constant 0 : i32
    %c0_i32_0 = arith.constant 0 : i32
    return %arg0, %c0_i32 : i32, i32
  }
  func.func @transform_1(%arg0: i32) -> (i32, i32) {
    %c0_i32 = arith.constant 0 : i32
    %c0_i32_0 = arith.constant 0 : i32
    %c0_i32_1 = arith.constant 0 : i32
    return %c0_i32, %c0_i32_0 : i32, i32
  }
  func.func @transform_2(%arg0: i32) -> (i32, i32) {
    %c0_i32 = arith.constant 0 : i32
    %c0_i32_0 = arith.constant 0 : i32
    %c0_i32_1 = arith.constant 0 : i32
    return %c0_i32, %c0_i32_0 : i32, i32
  }
  func.func @transform_3(%arg0: i32) -> (i32, i32) {
    %c0_i32 = arith.constant 0 : i32
    %c0_i32_0 = arith.constant 0 : i32
    %c0_i32_1 = arith.constant 0 : i32
    return %c0_i32, %c0_i32_0 : i32, i32
  }
  func.func @transform_4(%arg0: i32) -> (i32, i32) {
    %c0_i32 = arith.constant 0 : i32
    %c0_i32_0 = arith.constant 0 : i32
    %c0_i32_1 = arith.constant 0 : i32
    return %c0_i32, %c0_i32_0 : i32, i32
  }
  func.func @transform_5(%arg0: i32) -> (i32, i32) {
    %c0_i32 = arith.constant 0 : i32
    %c0_i32_0 = arith.constant 0 : i32
    return %arg0, %c0_i32 : i32, i32
  }
}

</mosaic_0001>

<bundles_post_ra>
// kernel: tpu_custom_call.1
= control target key start
LH: loop header
LB: loop body
LE: loop exit
PB: predicated region body
PF: predicated region fallthrough
CT: control target
= control target key end

     0   :  { %10 = vsyncpa [#allocation3], 0  ;;  %s489_s0 = inlined_call_operand.hbm [shape: f32[8,256], index: 0, kind: input, shape index: {}]   ;;  %s490_s1 = inlined_call_operand.hbm [shape: f32[256,256], index: 1, kind: input, shape index: {}]   ;;  %s491_s2 = inlined_call_operand.vmem [shape: f32[1,256], index: 2, kind: input, shape index: {}]   ;;  %s492_s3 = inlined_call_operand.vmem [shape: f32[1,256], index: 3, kind: input, shape index: {}]   ;;  %s493_s4 = inlined_call_operand.vmem [shape: f32[1,256], index: 4, kind: input, shape index: {}]   ;;  %s494_s5 = inlined_call_operand.hbm [shape: f32[8,256], index: 5, kind: output, shape index: {}]  }
   0x1   :  { %11 = vsyncpa [#allocation6], 0 }
   0x2   :  { %12 = vsyncpa [#allocation4], 0  ;;  %s402_s18 = smov [#allocation2]   ;;  %s403_s20 = smov [#allocation5]  }
   0x3   :  { %s19_s19 = sshll.u32 %s402_s18, 4  ;;  %s28_s21 = sshll.u32 %s403_s20, 4  ;;  %s20_s19 = int_to_ptr.vmem [resolvable:$true] %s19_s19  ;;  %s437_s21 = int_to_ptr.vmem [resolvable:$true] %s28_s21 }
   0x4   :  { %s330_s24 = scalar_lea.hbm %s489_s0, 256 }
   0x5   :  { %p331_p0 = scmp.ne.s32.totalorder %s489_s0, %s330_s24  ;;  %p334_p1 = scmp.lt.u32.totalorder %s330_s24, %s489_s0 }
   0x7   :  { %p336_p2 = pnand %p334_p1, %p331_p0 }
   0x9   :  { %339 = shalt.err (!%p336_p2)
}
   0xa   :  { %s340_s29 = scalar_lea.vmem %s20_s19, 256  ;;  %p345_p4 = scmp.lt.s32.totalorder %s20_s19, %s20_s19 }
   0xb   :  { %p341_p3 = scmp.ne.s32.totalorder %s20_s19, %s340_s29  ;;  %p346_p5 = scmp.lt.s32.totalorder %s340_s29, %s340_s29 }
   0xd   :  { %p347_p6 = por %p346_p5, %p345_p4 }
   0xf   :  { %p348_p7 = pnand %p347_p6, %p341_p3 }
  0x11   :  { %351 = shalt.err (!%p348_p7)
}
  0x12   :  { %22 = dma.hbm_to_vmem [thread:$0]  %s489_s0, 256, %s20_s19, [#allocation3]  }
  0x13   :  { %s352_s9 = scalar_lea.hbm %s490_s1, 8192 }
  0x14   :  { %p353_p8 = scmp.ne.s32.totalorder %s490_s1, %s352_s9  ;;  %p356_p9 = scmp.lt.u32.totalorder %s352_s9, %s490_s1 }
  0x16   :  { %p358_p10 = pnand %p356_p9, %p353_p8 }
  0x18   :  { %361 = shalt.err (!%p358_p10)
}
  0x19   :  { %s362_s14 = scalar_lea.vmem %s437_s21, 8192  ;;  %p367_p12 = scmp.lt.s32.totalorder %s437_s21, %s437_s21 }
  0x1a   :  { %p363_p11 = scmp.ne.s32.totalorder %s437_s21, %s362_s14  ;;  %p368_p13 = scmp.lt.s32.totalorder %s362_s14, %s362_s14 }
  0x1c   :  { %p369_p0 = por %p368_p13, %p367_p12 }
  0x1e   :  { %p370_p1 = pnand %p369_p0, %p363_p11 }
  0x20   :  { %373 = shalt.err (!%p370_p1)
}
  0x21   :  { %s404_s0 = smov 256   ;;  %s405_s15 = smov 16  }
  0x22   :  { %34 = dma.hbm_to_vmem [thread:$0]  %s490_s1, 8192, %s437_s21, [#allocation6], %s404_s0, %s404_s0, %s405_s15  }
  0x23   :  { %396 = dma.done.wait [#allocation3], 256  }
  0x24   :  { %397 = vsyncadd [#allocation3], 4294967040 }
  0x25   :  { %398 = dma.done.wait [#allocation6], 8192  }
  0x26   :  { %399 = vsyncadd [#allocation6], 4294959104  ;;  %v48_v0 = vld [vmem:[#allocation5 + $0x8] sm:$0xff]  ;;  %v50_v1 = vld [vmem:[#allocation5 + $0x18] sm:$0xff]  ;;  %s406_s22 = smov [#allocation7]  }
  0x27   :  { %v47_v2 = vld [vmem:[#allocation5] sm:$0xff]  ;;  %v259_v3 = vpack.c.bf16 %v50_v1, %v48_v0  ;;  %v49_v4 = vld [vmem:[#allocation5 + $0x10] sm:$0xff]  ;;  %v52_v5 = vld [vmem:[#allocation5 + $0x28] sm:$0xff]  ;;  %s249_s23 = sshll.u32 %s406_s22, 4  ;;  %s250_s23 = int_to_ptr.vmem [resolvable:$true] %s249_s23 }
  0x28   :  { %v54_v6 = vld [vmem:[#allocation5 + $0x38] sm:$0xff]  ;;  %v261_v7 = vpack.c.bf16 %v49_v4, %v47_v2  ;;  %v51_v9 = vld [vmem:[#allocation5 + $0x20] sm:$0xff]  ;;  %v53_v10 = vld [vmem:[#allocation5 + $0x30] sm:$0xff]  ;;  %p379_p3 = scmp.lt.s32.totalorder %s250_s23, %s250_s23 }
  0x29   :  { %v263_v8 = vpack.c.bf16 %v54_v6, %v52_v5  ;;  %v56_v11 = vld [vmem:[#allocation5 + $0x48] sm:$0xff]  ;;  %260 = vmatprep.subr.bf16.mxu0 %v259_v3  ;;  %v58_v12 = vld [vmem:[#allocation5 + $0x58] sm:$0xff]  ;;  %v265_v13 = vpack.c.bf16 %v53_v10, %v51_v9  ;;  %v55_v15 = vld [vmem:[#allocation5 + $0x40] sm:$0xff] }
  0x2a   :  { %262 = vmatpush1.bf16.msra.mxu0 %v261_v7  ;;  %v267_v14 = vpack.c.bf16 %v58_v12, %v56_v11  ;;  %v57_v16 = vld [vmem:[#allocation5 + $0x50] sm:$0xff]  ;;  %v60_v17 = vld [vmem:[#allocation5 + $0x68] sm:$0xff]  ;;  %v62_v18 = vld [vmem:[#allocation5 + $0x78] sm:$0xff] }
  0x2b   :  { %264 = vmatprep.subr.bf16.mxu0 %v263_v8  ;;  %v269_v19 = vpack.c.bf16 %v57_v16, %v55_v15  ;;  %v271_v20 = vpack.c.bf16 %v62_v18, %v60_v17  ;;  %v59_v21 = vld [vmem:[#allocation5 + $0x60] sm:$0xff]  ;;  %v61_v22 = vld [vmem:[#allocation5 + $0x70] sm:$0xff]  ;;  %v64_v23 = vld [vmem:[#allocation5 + $0x88] sm:$0xff] }
  0x2c   :  { %v66_v24 = vld [vmem:[#allocation5 + $0x98] sm:$0xff]  ;;  %v273_v25 = vpack.c.bf16 %v61_v22, %v59_v21  ;;  %v63_v27 = vld [vmem:[#allocation5 + $0x80] sm:$0xff]  ;;  %v65_v28 = vld [vmem:[#allocation5 + $0x90] sm:$0xff] }
  0x2d   :  { %v275_v26 = vpack.c.bf16 %v66_v24, %v64_v23  ;;  %v68_v29 = vld [vmem:[#allocation5 + $0xa8] sm:$0xff]  ;;  %v70_v30 = vld [vmem:[#allocation5 + $0xb8] sm:$0xff]  ;;  %v277_v31 = vpack.c.bf16 %v65_v28, %v63_v27  ;;  %v67_v33 = vld [vmem:[#allocation5 + $0xa0] sm:$0xff] }
  0x2e   :  { %266 = vmatpush1.bf16.msra.mxu0 %v265_v13  ;;  %v279_v32 = vpack.c.bf16 %v70_v30, %v68_v29  ;;  %v69_v34 = vld [vmem:[#allocation5 + $0xb0] sm:$0xff]  ;;  %v72_v35 = vld [vmem:[#allocation5 + $0xc8] sm:$0xff]  ;;  %v74_v36 = vld [vmem:[#allocation5 + $0xd8] sm:$0xff] }
  0x2f   :  { %268 = vmatprep.subr.bf16.mxu0 %v267_v14  ;;  %v281_v37 = vpack.c.bf16 %v69_v34, %v67_v33  ;;  %v283_v38 = vpack.c.bf16 %v74_v36, %v72_v35  ;;  %v71_v39 = vld [vmem:[#allocation5 + $0xc0] sm:$0xff]  ;;  %v73_v40 = vld [vmem:[#allocation5 + $0xd0] sm:$0xff]  ;;  %v112_v41 = vld [vmem:[#allocation2 + $0x8] sm:$0xff]  ;;  %v115_v34 = vlaneseq }
  0x30   :  { %v76_v42 = vld [vmem:[#allocation5 + $0xe8] sm:$0xff]  ;;  %v78_v43 = vld [vmem:[#allocation5 + $0xf8] sm:$0xff]  ;;  %189 = vmatprep.mubr.f32.mxu0 %v112_v41  ;;  %v285_v44 = vpack.c.bf16 %v73_v40, %v71_v39  ;;  %v75_v46 = vld [vmem:[#allocation5 + $0xe0] sm:$0xff] }
  0x31   :  { %v287_v45 = vpack.c.bf16 %v78_v43, %v76_v42  ;;  %v77_v47 = vld [vmem:[#allocation5 + $0xf0] sm:$0xff]  ;;  %v80_v48 = vld [vmem:[#allocation5 + $0x108] sm:$0xff]  ;;  %v82_v49 = vld [vmem:[#allocation5 + $0x118] sm:$0xff]  ;;  %v116_v35 = vshrl.u32 %v115_v34, 7 }
  0x32   :  { %270 = vmatpush1.bf16.msra.mxu0 %v269_v19  ;;  %v289_v50 = vpack.c.bf16 %v77_v47, %v75_v46  ;;  %v291_v51 = vpack.c.bf16 %v82_v49, %v80_v48  ;;  %v79_v52 = vld [vmem:[#allocation5 + $0x100] sm:$0xff]  ;;  %v81_v53 = vld [vmem:[#allocation5 + $0x110] sm:$0xff]  ;;  %v84_v54 = vld [vmem:[#allocation5 + $0x128] sm:$0xff] }
  0x33   :  { %272 = vmatprep.subr.bf16.mxu0 %v271_v20  ;;  %v86_v55 = vld [vmem:[#allocation5 + $0x138] sm:$0xff]  ;;  %v293_v56 = vpack.c.bf16 %v81_v53, %v79_v52  ;;  %v83_v58 = vld [vmem:[#allocation5 + $0x120] sm:$0xff]  ;;  %v85_v59 = vld [vmem:[#allocation5 + $0x130] sm:$0xff]  ;;  %v117_v36 = vsub.s32 0, %v116_v35 }
  0x34   :  { %v295_v57 = vpack.c.bf16 %v86_v55, %v84_v54  ;;  %v88_v60 = vld [vmem:[#allocation5 + $0x148] sm:$0xff]  ;;  %v90_v61 = vld [vmem:[#allocation5 + $0x158] sm:$0xff]  ;;  %v297_v62 = vpack.c.bf16 %v85_v59, %v83_v58  ;;  %v87_v0 = vld [vmem:[#allocation5 + $0x140] sm:$0xff] }
  0x35   :  { %v299_v63 = vpack.c.bf16 %v90_v61, %v88_v60  ;;  %v89_v1 = vld [vmem:[#allocation5 + $0x150] sm:$0xff]  ;;  %v92_v2 = vld [vmem:[#allocation5 + $0x168] sm:$0xff]  ;;  %v94_v3 = vld [vmem:[#allocation5 + $0x178] sm:$0xff] }
  0x36   :  { %274 = vmatpush1.bf16.msra.mxu0 %v273_v25  ;;  %v301_v4 = vpack.c.bf16 %v89_v1, %v87_v0  ;;  %v303_v5 = vpack.c.bf16 %v94_v3, %v92_v2  ;;  %v91_v6 = vld [vmem:[#allocation5 + $0x160] sm:$0xff]  ;;  %v93_v7 = vld [vmem:[#allocation5 + $0x170] sm:$0xff]  ;;  %v96_v8 = vld [vmem:[#allocation5 + $0x188] sm:$0xff] }
  0x37   :  { %276 = vmatprep.subr.bf16.mxu0 %v275_v26  ;;  %v98_v9 = vld [vmem:[#allocation5 + $0x198] sm:$0xff]  ;;  %v305_v10 = vpack.c.bf16 %v93_v7, %v91_v6  ;;  %v95_v12 = vld [vmem:[#allocation5 + $0x180] sm:$0xff]  ;;  %v97_v13 = vld [vmem:[#allocation5 + $0x190] sm:$0xff] }
  0x38   :  { %v307_v11 = vpack.c.bf16 %v98_v9, %v96_v8  ;;  %v100_v14 = vld [vmem:[#allocation5 + $0x1a8] sm:$0xff]  ;;  %v102_v15 = vld [vmem:[#allocation5 + $0x1b8] sm:$0xff]  ;;  %v309_v16 = vpack.c.bf16 %v97_v13, %v95_v12  ;;  %v99_v18 = vld [vmem:[#allocation5 + $0x1a0] sm:$0xff] }
  0x39   :  { %v311_v17 = vpack.c.bf16 %v102_v15, %v100_v14  ;;  %v101_v19 = vld [vmem:[#allocation5 + $0x1b0] sm:$0xff]  ;;  %v104_v20 = vld [vmem:[#allocation5 + $0x1c8] sm:$0xff]  ;;  %v106_v21 = vld [vmem:[#allocation5 + $0x1d8] sm:$0xff] }
  0x3a   :  { %278 = vmatpush1.bf16.msra.mxu0 %v277_v31  ;;  %v313_v22 = vpack.c.bf16 %v101_v19, %v99_v18  ;;  %v315_v23 = vpack.c.bf16 %v106_v21, %v104_v20  ;;  %v103_v24 = vld [vmem:[#allocation5 + $0x1c0] sm:$0xff]  ;;  %v105_v25 = vld [vmem:[#allocation5 + $0x1d0] sm:$0xff]  ;;  %v108_v26 = vld [vmem:[#allocation5 + $0x1e8] sm:$0xff] }
  0x3b   :  { %280 = vmatprep.subr.bf16.mxu0 %v279_v32  ;;  %v110_v27 = vld [vmem:[#allocation5 + $0x1f8] sm:$0xff]  ;;  %v317_v28 = vpack.c.bf16 %v105_v25, %v103_v24  ;;  %v107_v30 = vld [vmem:[#allocation5 + $0x1e0] sm:$0xff]  ;;  %v109_v31 = vld [vmem:[#allocation5 + $0x1f0] sm:$0xff] }
  0x3c   :  { %v319_v29 = vpack.c.bf16 %v110_v27, %v108_v26  ;;  %v321_v32 = vpack.c.bf16 %v109_v31, %v107_v30  ;;  %v111_v33 = vld [vmem:[#allocation2] sm:$0xff] }
  0x3e   :  { %282 = vmatpush1.bf16.msra.mxu0 %v281_v37  ;;  %v113_v37 = vld [vmem:[%s491_s2] sm:$0x3] }
  0x3f   :  { %284 = vmatprep.subr.bf16.mxu0 %v283_v38  ;;  %v121_v38 = vsub.s32 1, %v116_v35  ;;  %v118_v39 = vrot.slane %v113_v37, %v117_v36 }
  0x41   :  { %v122_v40 = vrot.slane %v113_v37, %v121_v38 }
  0x42   :  { %286 = vmatpush1.bf16.msra.mxu0 %v285_v44 }
  0x43   :  { %288 = vmatprep.subr.bf16.mxu0 %v287_v45 }
  0x46   :  { %290 = vmatpush1.bf16.msra.mxu0 %v289_v50 }
  0x47   :  { %292 = vmatprep.subr.bf16.mxu0 %v291_v51 }
  0x4a   :  { %294 = vmatpush1.bf16.msra.mxu0 %v293_v56  ;;  %v213_v56 = vld [vmem:[%s492_s3] sm:$0x3]  ;;  %s374_s3 = scalar_lea.vmem %s250_s23, 256 }
  0x4b   :  { %296 = vmatprep.subr.bf16.mxu0 %v295_v57  ;;  %v227_v57 = vld [vmem:[%s493_s4] sm:$0x3]  ;;  %v218_v58 = vrot.slane %v213_v56, %v117_v36  ;;  %v222_v59 = vrot.slane %v213_v56, %v121_v38  ;;  %p375_p2 = scmp.ne.s32.totalorder %s250_s23, %s374_s3  ;;  %p380_p4 = scmp.lt.s32.totalorder %s374_s3, %s374_s3 }
  0x4c   :  { %v236_v0 = vrot.slane %v227_v57, %v121_v38 }
  0x4d   :  { %p381_p5 = por %p380_p4, %p379_p3 }
  0x4e   :  { %298 = vmatpush1.bf16.msra.mxu0 %v297_v62 }
  0x4f   :  { %300 = vmatprep.subr.bf16.mxu0 %v299_v63  ;;  %v232_v63 = vrot.slane %v227_v57, %v117_v36  ;;  %p382_p6 = pnand %p381_p5, %p375_p2 }
  0x52   :  { %302 = vmatpush1.bf16.msra.mxu0 %v301_v4 }
  0x53   :  { %304 = vmatprep.subr.bf16.mxu0 %v303_v5 }
  0x56   :  { %306 = vmatpush1.bf16.msra.mxu0 %v305_v10 }
  0x57   :  { %308 = vmatprep.subr.bf16.mxu0 %v307_v11 }
  0x5a   :  { %310 = vmatpush1.bf16.msra.mxu0 %v309_v16 }
  0x5b   :  { %312 = vmatprep.subr.bf16.mxu0 %v311_v17 }
  0x5e   :  { %314 = vmatpush1.bf16.msra.mxu0 %v313_v22 }
  0x5f   :  { %316 = vmatprep.subr.bf16.mxu0 %v315_v23 }
  0x62   :  { %318 = vmatpush1.bf16.msra.mxu0 %v317_v28 }
  0x63   :  { %320 = vmatprep.subr.bf16.mxu0 %v319_v29 }
  0x66   :  { %322 = vmatpush1.bf16.msra.mxu0 %v321_v32 }
  0x69   :  { %190 = vmatmul.mubr.f32.vlgmr.msra.gmra.mrb[0].mxu0 %v111_v33 }
 0x13c   :  { %v191_v41 = vpop.f32.mrb[0].mxu0 }
 0x13d   :  { %v192_v42 = vadd.f32 %v191_v41, %v118_v39  ;;  %v193_v43 = vpop.f32.mrb[1].mxu0 }
 0x13e   :  { %v194_v44 = vadd.f32 %v193_v43, %v122_v40 }
 0x140   :  { %v196_v45 = vadd.f32 %v194_v44, %v192_v42 }
 0x142   :  { %197 = vadd.xlane.f32.xlu0 %v196_v45 }
 0x1cf   :  { %v198_v46 = vpop.xlane.xlu0 %197 }
 0x1d0   :  { %v200_v47 = vmul.f32 0.00390625, %v198_v46 }
 0x1d2   :  { %v201_v48 = vsub.f32 %v192_v42, %v200_v47  ;;  %v202_v49 = vsub.f32 %v194_v44, %v200_v47 }
 0x1d4   :  { %v203_v50 = vmul.f32 %v201_v48, %v201_v48  ;;  %v204_v51 = vmul.f32 %v202_v49, %v202_v49 }
 0x1d6   :  { %v205_v52 = vadd.f32 %v204_v51, %v203_v50 }
 0x1d8   :  { %206 = vadd.xlane.f32.xlu0 %v205_v52 }
 0x265   :  { %v207_v53 = vpop.xlane.xlu0 %206 }
 0x266   :  { %v208_v54 = vmul.f32 0.00390625, %v207_v53 }
 0x268   :  { %v209_v55 = vadd.f32 1e-05, %v208_v54 }
 0x26a   :  { %328 = vrsqrt.f32 %v209_v55 }
 0x274   :  { %v329_v60 = vpop.eup %328 }
 0x275   :  { %v211_v61 = vmul.f32 %v329_v60, %v201_v48  ;;  %v212_v62 = vmul.f32 %v329_v60, %v202_v49 }
 0x277   :  { %v225_v1 = vmul.f32 %v218_v58, %v211_v61  ;;  %v226_v2 = vmul.f32 %v222_v59, %v212_v62 }
 0x279   :  { %v239_v3 = vadd.f32 %v232_v63, %v225_v1  ;;  %v240_v4 = vadd.f32 %v236_v0, %v226_v2 }
 0x27b   :  { %241 = vst [vmem:[#allocation7] sm:$0xff] %v239_v3  ;;  %242 = vst [vmem:[#allocation7 + $0x8] sm:$0xff] %v240_v4 }
 0x27c   :  { %385 = shalt.err (!%p382_p6)
}
 0x27d   :  { %s386_s25 = scalar_lea.hbm %s494_s5, 256 }
 0x27e   :  { %p387_p7 = scmp.ne.s32.totalorder %s494_s5, %s386_s25  ;;  %p390_p8 = scmp.lt.u32.totalorder %s386_s25, %s494_s5 }
 0x280   :  { %p392_p9 = pnand %p390_p8, %p387_p7 }
 0x282   :  { %395 = shalt.err (!%p392_p9)
}
 0x283   :  { %252 = dma.vmem_to_hbm [thread:$0]  %s250_s23, 256, %s494_s5, [#allocation4]  }
 0x284   :  { %400 = dma.done.wait [#allocation4], 256  }
 0x285   :  { %401 = vsyncadd [#allocation4], 4294967040 }
 0x286   :  { %256 = vsyncpa [#allocation3], 1 }
 0x287   :  { %257 = vsyncpa [#allocation6], 1 }
 0x288   :  { %258 = vsyncpa [#allocation4], 1 }

</bundles_post_ra>
